<compile_context>
chip_gen: v6e
topology: v6e:2x2x1
jax: 0.10.0
libtpu: 0.0.40
codegen_flags: <defaults>
</compile_context>

<pallas_src>
import functools

import jax
import jax.numpy as jnp
from jax.experimental import pallas as pl
from jax.experimental.pallas import tpu as pltpu

_LANE_CHOICES = (1024, 512, 256, 128)
_MIB = 1024 * 1024


# ---------------- hardware-aware sizing ----------------
def _device_kind():
    try:
        return jax.devices()[0].device_kind.lower()
    except Exception:
        return ""


def _is_v7():
    return "v7" in _device_kind()


def _is_v5():
    return "v5" in _device_kind()


def _vmem_capacity_bytes():
    try:
        return int(pltpu.get_tpu_info().vmem_capacity_bytes)
    except Exception:
        return (64 if _is_v7() else 128) * _MIB


def _block_byte_budget():
    # v7x: bigger blocks amortize per-grid-step overhead against 3.2 TB/s HBM.
    # v5e/v6e: ~4 MiB already sits on the HBM-roofline plateau and, double-buffered
    # in+out, stays within the scoped-VMEM budget we request explicitly below.
    return (8 * _MIB) if _is_v7() else (4 * _MIB)


def _compute_dtype(dtype, name):
    dtype = jnp.dtype(dtype)
    if name == "mish":
        return jnp.float32                       # transcendental path stays in f32
    if dtype == jnp.dtype(jnp.float32):
        return jnp.float32
    if dtype == jnp.dtype(jnp.bfloat16) and not _is_v5():
        return jnp.bfloat16                      # v6e/v7x VALUs are bf16-native
    return jnp.float32                           # v5e has no bf16 VALU: widen


# ---------------- kernels (elementwise on VPU/EUP) ----------------
def _make_relu_kernel(cdt):
    def kernel(x_ref, o_ref):
        x = x_ref[...].astype(cdt)
        o_ref[...] = jnp.maximum(x, 0).astype(o_ref.dtype)
    return kernel


def _make_prelu_kernel(cdt):
    # PyTorch PReLU default: num_parameters=1, init=0.25 (scalar weight in SMEM).
    def kernel(a_ref, x_ref, o_ref):
        a = a_ref[0].astype(cdt)                 # read once; stays scalar
        x = x_ref[...].astype(cdt)
        o_ref[...] = jnp.where(x >= 0, x, x * a).astype(o_ref.dtype)
    return kernel


def _mish_kernel(x_ref, o_ref):
    x = x_ref[...].astype(jnp.float32)
    # tanh(softplus(x)) = u / (u + 2) with u = t*(t+2), t = exp(x): a single EUP exp.
    t = jnp.exp(jnp.minimum(x, 20.0))
    u = t * (t + 2.0)
    # TODO(synk): on v7x, if profiling shows the EUP slot saturating, switch to
    #   u * pl.reciprocal(u + 2.0, approx=True)  (and re-validate the 1e-4 tolerance).
    r = u / (u + 2.0)
    # PyTorch softplus threshold=20: softplus(x) = x for x > 20 and tanh(x) == 1 in f32.
    o_ref[...] = jnp.where(x > 20.0, x, x * r).astype(o_ref.dtype)


# ---------------- layout / block selection ----------------
def _choose_lane(n):
    for lane in _LANE_CHOICES:
        if n >= lane and n % lane == 0:
            return lane
    return 128                                   # ragged: kernel runs on aligned prefix


def _choose_block_rows(rows, lane, itemsize):
    sublane_mult = 8 * max(1, 4 // itemsize)     # 8 f32, 16 bf16, 32 int8/fp8
    if rows <= sublane_mult:
        return rows                              # single full-extent block (legal)
    budget_rows = _block_byte_budget() // (lane * itemsize)
    block_rows = max(sublane_mult, (budget_rows // sublane_mult) * sublane_mult)
    if rows >= 2 * sublane_mult:
        # Keep >= 2 grid steps so v7x can shard the parallel axis across both TCs
        # (and the pipeline has something to overlap on v5e/v6e).
        half = -(-rows // 2)
        half = -(-half // sublane_mult) * sublane_mult
        block_rows = min(block_rows, half)
    return min(block_rows, rows)


def _run_pallas(x2, name, w):
    rows, lane = x2.shape
    itemsize = jnp.dtype(x2.dtype).itemsize
    block_rows = _choose_block_rows(rows, lane, itemsize)
    grid = (pl.cdiv(rows, block_rows),)
    tile = pl.BlockSpec((block_rows, lane), lambda i: (i, 0))
    out_shape = jax.ShapeDtypeStruct(x2.shape, x2.dtype)

    # in+out, double-buffered = 4 x block; extra headroom for in-kernel intermediates.
    block_io_bytes = block_rows * lane * itemsize
    vmem_limit = min(_vmem_capacity_bytes() - 16 * _MIB,
                     4 * block_io_bytes + 24 * _MIB)
    vmem_limit = int(max(vmem_limit, 16 * _MIB))
    cparams = pltpu.CompilerParams(dimension_semantics=("parallel",),
                                   vmem_limit_bytes=vmem_limit)

    cdt = _compute_dtype(x2.dtype, name)
    if name == "relu":
        return pl.pallas_call(
            _make_relu_kernel(cdt), out_shape=out_shape, grid=grid,
            in_specs=[tile], out_specs=tile, compiler_params=cparams)(x2)
    if name == "prelu":
        return pl.pallas_call(
            _make_prelu_kernel(cdt), out_shape=out_shape, grid=grid,
            in_specs=[pl.BlockSpec(memory_space=pltpu.MemorySpace.SMEM), tile],
            out_specs=tile, compiler_params=cparams)(w, x2)
    # mish
    return pl.pallas_call(
        _mish_kernel, out_shape=out_shape, grid=grid,
        in_specs=[tile], out_specs=tile, compiler_params=cparams)(x2)


def _jnp_act(x, name, w):
    # Plain-jnp path for the tiny (<128 elem) ragged tail / tiny inputs.
    xf = x.astype(jnp.float32)
    if name == "relu":
        r = jnp.maximum(xf, 0.0)
    elif name == "prelu":
        r = jnp.where(xf >= 0.0, xf, xf * w[0])
    else:  # mish
        sp = jnp.where(xf > 20.0, xf, jnp.log1p(jnp.exp(jnp.minimum(xf, 20.0))))
        r = xf * jnp.tanh(sp)
    return r.astype(x.dtype)


# ---------------- wrapper ----------------
@functools.partial(jax.jit, static_argnames=("name",))
def _activation_jit(x, prelu_weight, name):
    orig_shape = x.shape
    flat = x.reshape(-1)                         # original dtype stays in HBM
    n = flat.shape[0]
    lane = _choose_lane(n)
    rows = n // lane
    n_main = rows * lane

    pieces = []
    if n_main == n:
        pieces.append(_run_pallas(flat.reshape(rows, lane), name, prelu_weight).reshape(-1))
    else:
        if n_main > 0:
            pieces.append(
                _run_pallas(flat[:n_main].reshape(rows, lane), name, prelu_weight).reshape(-1))
        pieces.append(_jnp_act(flat[n_main:], name, prelu_weight))
    out_flat = pieces[0] if len(pieces) == 1 else jnp.concatenate(pieces)
    return out_flat.reshape(orig_shape)


def activation(x, name="relu", prelu_weight=None):
    """Apply relu / prelu / mish elementwise (matches the PyTorch Activation module)."""
    if name not in ("relu", "prelu", "mish"):
        raise ValueError(f"unknown activation: {name}")
    if name == "prelu":
        if prelu_weight is None:
            prelu_weight = jnp.full((1,), 0.25, dtype=jnp.float32)  # torch PReLU default init
        prelu_weight = jnp.asarray(prelu_weight, dtype=jnp.float32).reshape(-1)
        if prelu_weight.shape[0] != 1:
            # TODO(synk): per-channel PReLU (num_parameters=C) needs a channel-aware layout.
            raise ValueError("only scalar PReLU (num_parameters=1) is supported")
    else:
        prelu_weight = jnp.zeros((1,), dtype=jnp.float32)            # unused placeholder
    return _activation_jit(x, prelu_weight, name)


# ---------------- pure-JAX references for correctness check ----------------
def _ref(x, name, w):
    x32 = x.astype(jnp.float32)
    if name == "relu":
        r = jnp.maximum(x32, 0.0)
    elif name == "prelu":
        r = jnp.where(x32 >= 0.0, x32, w[0] * x32)
    else:
        sp = jnp.where(x32 > 20.0, x32, jnp.log1p(jnp.exp(jnp.minimum(x32, 20.0))))
        r = x32 * jnp.tanh(sp)
    return r.astype(x.dtype)


if __name__ == "__main__":
    key = jax.random.PRNGKey(0)
    k1, k2, k3 = jax.random.split(key, 3)
    prelu_w = jnp.full((1,), 0.25, dtype=jnp.float32)     # PReLU default init

    x_main = jax.random.normal(k1, (2, 4, 16, 16), dtype=jnp.float32) * 3.0
    # ragged size (3003 elems): exercises kernel prefix + jnp tail + partial final block
    x_ragged = jax.random.normal(k2, (3, 7, 11, 13), dtype=jnp.float32) * 3.0
    x_bf16 = (jax.random.normal(k3, (2, 4, 16, 16), dtype=jnp.float32) * 3.0).astype(jnp.bfloat16)

    tols = {"relu": 0.0, "prelu": 1e-6, "mish": 1e-4}
    for name in ("relu", "prelu", "mish"):
        for xin in (x_main, x_ragged):
            out = jax.block_until_ready(activation(xin, name=name, prelu_weight=prelu_w))
            ref = _ref(xin, name, prelu_w)
            assert out.shape == xin.shape and out.dtype == xin.dtype
            assert jnp.allclose(out, ref, atol=tols[name], rtol=1e-5), f"{name} mismatch"

    # bf16 relu exercises the native-dtype (no f32 widen) compute path on v6e/v7x.
    out_bf16 = jax.block_until_ready(activation(x_bf16, name="relu"))
    assert out_bf16.dtype == x_bf16.dtype
    assert jnp.array_equal(out_bf16, _ref(x_bf16, "relu", prelu_w)), "bf16 relu mismatch"

    print("KERNEL_OK")
</pallas_src>

<mosaic_0001>
module attributes {stable_mosaic.version = 11 : i64} {
  func.func @kernel(%arg0: i32, %arg1: memref<2x1024xf32, #tpu.memory_space<vmem>>, %arg2: memref<2x1024xf32, #tpu.memory_space<vmem>>) attributes {dimension_semantics = [#tpu.dimension_semantics<parallel>], iteration_bounds = array<i64: 1>, scalar_prefetch = 0 : i64, scratch_operands = 0 : i64, tpu.core_type = #tpu.core_type<tc>, window_params = [{transform_indices = @transform_0, window_bounds = array<i64: 2, 1024>}, {transform_indices = @transform_1, window_bounds = array<i64: 2, 1024>}]} {
    %c0 = arith.constant 0 : index
    %c0_0 = arith.constant 0 : index
    %0 = vector.load %arg1[%c0, %c0_0] : memref<2x1024xf32, #tpu.memory_space<vmem>>, vector<2x1024xf32>
    %cst = arith.constant 0.000000e+00 : f32
    %1 = vector.broadcast %cst : f32 to vector<2x1024xf32>
    %2 = arith.maximumf %0, %1 : vector<2x1024xf32>
    %c0_1 = arith.constant 0 : index
    %c0_2 = arith.constant 0 : index
    %3 = vector.load %arg2[%c0_1, %c0_2] : memref<2x1024xf32, #tpu.memory_space<vmem>>, vector<2x1024xf32>
    tpu.vector_store %arg2[%c0_1, %c0_2], %2 {strides = array<i32>} : memref<2x1024xf32, #tpu.memory_space<vmem>>, vector<2x1024xf32>,
    return
  }
  func.func @transform_0(%arg0: i32) -> (i32, i32) {
    %c0_i32 = arith.constant 0 : i32
    %c0_i32_0 = arith.constant 0 : i32
    return %arg0, %c0_i32 : i32, i32
  }
  func.func @transform_1(%arg0: i32) -> (i32, i32) {
    %c0_i32 = arith.constant 0 : i32
    %c0_i32_0 = arith.constant 0 : i32
    return %arg0, %c0_i32 : i32, i32
  }
}

</mosaic_0001>

<bundles_post_ra>
// kernel: _activation_jit.1
= control target key start
LH: loop header
LB: loop body
LE: loop exit
PB: predicated region body
PF: predicated region fallthrough
CT: control target
= control target key end

     0   :  { %s40_s0 = inlined_call_operand.vmem [shape: f32[2,1024], index: 0, kind: input, shape index: {}]   ;;  %s41_s1 = inlined_call_operand.vmem [shape: f32[2,1024], index: 1, kind: output, shape index: {}]  }
   0x1   :  { %v8_v0 = vld [vmem:[%s40_s0] sm:$0xff]  ;;  %v9_v1 = vld [vmem:[%s40_s0 + $0x8] sm:$0xff] }
   0x2   :  { %v10_v2 = vmax.f32 %v8_v0, 0.0  ;;  %v11_v3 = vmax.f32 %v9_v1, 0.0 }
   0x4   :  { %12 = vst [vmem:[%s41_s1] sm:$0xff] %v10_v2  ;;  %13 = vst [vmem:[%s41_s1 + $0x8] sm:$0xff] %v11_v3 }

</bundles_post_ra>
